<compile_context>
chip_gen: v5e
topology: v5e:2x2
jax: 0.10.0
libtpu: 0.0.40
codegen_flags: <defaults>
</compile_context>

<pallas_src>
import functools

import jax
import jax.numpy as jnp
from jax import lax
from jax.experimental import pallas as pl
from jax.experimental.pallas import tpu as pltpu


def _customized_loss_kernel(pred_ref, true_ref, out_ref, acc_h_ref, acc_d_ref, *,
                            b, t, btile, nb_inner, nb_full):
    p = pl.program_id(0)          # partition (per-TensorCore on multi-TC chips)
    i = pl.program_id(1)          # batch-block within the partition ("arbitrary")
    blk = p * nb_inner + i        # logical (unclamped) block index

    @pl.when(i == 0)
    def _init():
        acc_h_ref[...] = jnp.zeros_like(acc_h_ref)
        acc_d_ref[...] = jnp.zeros_like(acc_d_ref)

    pred = pred_ref[...].astype(jnp.float32)   # (btile, t)
    true = true_ref[...].astype(jnp.float32)   # (btile, t)

    # ---- Huber (delta = 1.0) per-element values ----
    err = pred - true
    abs_err = jnp.abs(err)
    huber_elem = jnp.where(abs_err <= 1.0, 0.5 * err * err, abs_err - 0.5)

    # ---- Directional term: time diffs via XLU roll (no lane-slice copies) ----
    # rolled[:, j] = x[:, (j+1) % t]  =>  d[:, j] = x[:, j+1] - x[:, j] for j < t-1.
    dp = pltpu.roll(pred, shift=t - 1, axis=1) - pred
    dq = pltpu.roll(true, shift=t - 1, axis=1) - true
    # Exact sign(dp) == sign(dq): both >0, both <0, or both ==0 (no product,
    # so no underflow misclassification).
    same_sign = (((dp > 0.0) & (dq > 0.0))
                 | ((dp < 0.0) & (dq < 0.0))
                 | ((dp == 0.0) & (dq == 0.0)))
    dir_elem = jnp.where(same_sign, 1.0, 0.0)
    # The wrap-around column (j == t-1) is accumulated here and dropped once in
    # _finalize, so the steady-state loop carries no column mask at all.

    # ---- Fast path: fully in-range block, plain VPU accumulate (no masks) ----
    @pl.when(blk < nb_full)
    def _accumulate_full():
        acc_h_ref[...] += huber_elem
        acc_d_ref[...] += dir_elem

    # ---- Slow path: ragged last block or clamped duplicate block ----
    @pl.when(blk >= nb_full)
    def _accumulate_masked():
        row_ids = blk * btile + lax.broadcasted_iota(jnp.int32, (btile, t), 0)
        row_ok = row_ids < b          # clamped duplicates -> all rows masked out
        acc_h_ref[...] += jnp.where(row_ok, huber_elem, 0.0)
        acc_d_ref[...] += jnp.where(row_ok, dir_elem, 0.0)

    # ---- Finalize this partition's partial sums into a lane-dense block ----
    @pl.when(i == nb_inner - 1)
    def _finalize():
        h_sum = jnp.sum(acc_h_ref[...])
        col_ids = lax.broadcasted_iota(jnp.int32, (btile, t), 1)
        d_sum = jnp.sum(jnp.where(col_ids < t - 1, acc_d_ref[...], 0.0))
        r = lax.broadcasted_iota(jnp.int32, (1, 8, 128), 1)
        c = lax.broadcasted_iota(jnp.int32, (1, 8, 128), 2)
        out_ref[...] = jnp.where((r == 0) & (c == 0), h_sum,
                                 jnp.where((r == 0) & (c == 1), d_sum, 0.0))


def _round_up(x, m):
    return (x + m - 1) // m * m


def _tpu_generation():
    """Best-effort local TPU info: (kind, is_v7x, multi_tensorcore, vmem_phys)."""
    kind = ""
    try:
        kind = jax.devices()[0].device_kind.lower()
    except Exception:
        pass
    is_v7 = "v7" in kind
    # Chips where one Pallas device spans 2 TensorCores: v4/v5p (megacore), v7x.
    multi_tc = is_v7 or ("v4" in kind) or ("v5p" in kind)
    vmem_phys = (64 << 20) if is_v7 else (128 << 20)
    return kind, is_v7, multi_tc, vmem_phys


def customized_loss(y_pred, y_true, *, alpha=1.0, beta=0.1, block_rows=None,
                    stream_dtype=None):
    """JAX/Pallas equivalent of CustomizedLoss.forward. Always returns float32."""
    # Glue: squeeze trailing singleton (the (B, T, 1) -> (B, T) path).
    if y_pred.ndim == 3 and y_pred.shape[-1] == 1:
        y_pred = jnp.squeeze(y_pred, -1)
    if y_true.ndim == 3 and y_true.shape[-1] == 1:
        y_true = jnp.squeeze(y_true, -1)
    if y_pred.shape != y_true.shape:
        raise ValueError(
            f"Shapes must match for DirectionalLoss: {y_pred.shape} vs {y_true.shape}")
    b, t = y_pred.shape

    if t < 2:
        # Degenerate path stays in plain JAX: PyTorch's DirectionalLoss returns
        # 0.0 when there are fewer than 2 time steps.
        # TODO(synk): no kernel for the t<2 branch (no time-diff exists).
        err = y_pred.astype(jnp.float32) - y_true.astype(jnp.float32)
        abs_err = jnp.abs(err)
        huber = jnp.mean(jnp.where(abs_err <= 1.0, 0.5 * err * err, abs_err - 0.5))
        return (alpha * huber).astype(jnp.float32)

    if stream_dtype is not None:
        # Optional (numerics-permitting): stream narrower bytes; math stays f32.
        y_pred = y_pred.astype(stream_dtype)
        y_true = y_true.astype(stream_dtype)

    kind, is_v7, multi_tc, vmem_phys = _tpu_generation()
    itemsize = y_pred.dtype.itemsize
    row_mult = max(8, 32 // max(1, itemsize))   # sublane packing: 8 f32, 16 bf16

    # ---- Tile sizing (generation-aware): ~2 MiB/input buffer on v5e (16 MiB
    #      scoped default headroom), ~4 MiB on v6e/v7x. Total VMEM per step =
    #      2 inputs x 2 pipeline buffers + 2 f32 (btile, t) accumulators.
    if block_rows is not None:                  # test/override hook
        btile = max(row_mult, _round_up(block_rows, row_mult))
    else:
        is_v5e = ("v5 lite" in kind) or ("v5e" in kind) or ("v5lite" in kind)
        target_buf = (2 << 20) if is_v5e else (4 << 20)
        bytes_per_row = max(1, t * itemsize)
        btile = max(row_mult, (target_buf // bytes_per_row) // row_mult * row_mult)
    btile = min(btile, _round_up(b, row_mult))

    nb_total = pl.cdiv(b, btile)
    nb_full = b // btile                        # blocks with no ragged rows
    n_partitions = 2 if (multi_tc and nb_total >= 2) else 1
    nb_inner = pl.cdiv(nb_total, n_partitions)

    # Explicit VMEM budget for the compiler (inputs double-buffered + accums).
    est_vmem = btile * t * (4 * itemsize + 2 * 4) + (1 << 20)
    vmem_limit = int(min(max(est_vmem * 3 // 2, 32 << 20), int(vmem_phys * 0.9)))
    vmem_limit = int(max(vmem_limit, est_vmem + (1 << 20)))

    def in_index_map(p, i):
        # Clamp so logically out-of-range blocks re-read the last valid block;
        # the in-kernel row mask zeroes their contribution.
        return (jnp.minimum(p * nb_inner + i, nb_total - 1), 0)

    kernel = functools.partial(
        _customized_loss_kernel, b=b, t=t, btile=btile,
        nb_inner=nb_inner, nb_full=nb_full)

    if n_partitions > 1:
        # v7x: shard the leading axis across the two TensorCores; v4/v5p
        # megacore splits "parallel" dims automatically.
        lead_sem = getattr(pltpu, "CORE_PARALLEL", "parallel") if is_v7 else "parallel"
    else:
        lead_sem = "arbitrary"

    cost = pl.CostEstimate(
        flops=26 * b * t,
        transcendentals=0,
        bytes_accessed=2 * b * t * itemsize + n_partitions * 8 * 128 * 4)

    partials = pl.pallas_call(
        kernel,
        out_shape=jax.ShapeDtypeStruct((n_partitions, 8, 128), jnp.float32),
        grid_spec=pltpu.PrefetchScalarGridSpec(
            num_scalar_prefetch=0,
            grid=(n_partitions, nb_inner),
            in_specs=[
                pl.BlockSpec((btile, t), in_index_map),
                pl.BlockSpec((btile, t), in_index_map),
            ],
            out_specs=pl.BlockSpec((1, 8, 128), lambda p, i: (p, 0, 0)),
            scratch_shapes=[
                pltpu.VMEM((btile, t), jnp.float32),   # Huber accumulator
                pltpu.VMEM((btile, t), jnp.float32),   # directional accumulator
            ],
        ),
        compiler_params=pltpu.CompilerParams(
            dimension_semantics=(lead_sem, "arbitrary"),
            vmem_limit_bytes=vmem_limit),
        cost_estimate=cost,
    )(y_pred, y_true)

    # Tiny final combine in f32 (n_partitions * 2 scalars).
    huber_sum = jnp.sum(partials[:, 0, 0])
    correct_sum = jnp.sum(partials[:, 0, 1])
    huber_mean = huber_sum / jnp.float32(b * t)
    dir_loss = 1.0 - correct_sum / jnp.float32(b * (t - 1))
    return (jnp.float32(alpha) * huber_mean
            + jnp.float32(beta) * dir_loss).astype(jnp.float32)


def _reference_loss(y_pred, y_true, *, alpha, beta):
    """Pure-JAX reference mirroring the PyTorch module."""
    if y_pred.ndim == 3 and y_pred.shape[-1] == 1:
        y_pred = jnp.squeeze(y_pred, -1)
    if y_true.ndim == 3 and y_true.shape[-1] == 1:
        y_true = jnp.squeeze(y_true, -1)
    yp = y_pred.astype(jnp.float32)
    yt = y_true.astype(jnp.float32)
    err = yp - yt
    abs_err = jnp.abs(err)
    huber = jnp.mean(jnp.where(abs_err <= 1.0, 0.5 * err * err, abs_err - 0.5))
    dp = yp[:, 1:] - yp[:, :-1]
    dt = yt[:, 1:] - yt[:, :-1]
    dir_loss = 1.0 - jnp.mean((jnp.sign(dp) == jnp.sign(dt)).astype(jnp.float32))
    return alpha * huber + beta * dir_loss


if __name__ == "__main__":
    key = jax.random.PRNGKey(0)
    k1, k2, k3, k4 = jax.random.split(key, 4)

    # Primary demo shape: (B, T, 1) as in the PyTorch (N, L, 1) use case.
    B, T = 4, 128
    y_pred = jax.random.normal(k1, (B, T, 1), dtype=jnp.float32)
    y_true = jax.random.normal(k2, (B, T, 1), dtype=jnp.float32)

    loss = customized_loss(y_pred, y_true, alpha=1.0, beta=0.1)
    jax.block_until_ready(loss)
    ref = _reference_loss(y_pred, y_true, alpha=1.0, beta=0.1)
    assert jnp.allclose(loss, ref, atol=1e-5, rtol=1e-5), (loss, ref)

    # Secondary check: multi-block grid with a ragged final batch block (and a
    # clamped duplicate block on multi-TensorCore chips) at forced small tiles.
    B2, T2 = 20, 128
    yp2 = jax.random.normal(k3, (B2, T2), dtype=jnp.float32)
    yt2 = jax.random.normal(k4, (B2, T2), dtype=jnp.float32)
    loss2 = customized_loss(yp2, yt2, alpha=1.0, beta=0.1, block_rows=8)
    jax.block_until_ready(loss2)
    ref2 = _reference_loss(yp2, yt2, alpha=1.0, beta=0.1)
    assert jnp.allclose(loss2, ref2, atol=1e-5, rtol=1e-5), (loss2, ref2)

    print("KERNEL_OK")
</pallas_src>

<mosaic_0001>
module attributes {stable_mosaic.version = 11 : i64} {
  func.func @_customized_loss_kernel(%arg0: i32, %arg1: i32, %arg2: memref<8x128xf32, #tpu.memory_space<vmem>>, %arg3: memref<8x128xf32, #tpu.memory_space<vmem>>, %arg4: memref<1x8x128xf32, #tpu.memory_space<vmem>>, %arg5: memref<8x128xf32, #tpu.memory_space<vmem>>, %arg6: memref<8x128xf32, #tpu.memory_space<vmem>>) attributes {dimension_semantics = [#tpu.dimension_semantics<arbitrary>, #tpu.dimension_semantics<arbitrary>], iteration_bounds = array<i64: 1, 1>, scalar_prefetch = 0 : i64, scratch_operands = 2 : i64, tpu.core_type = #tpu.core_type<tc>, window_params = [{transform_indices = @transform_0, window_bounds = array<i64: 8, 128>}, {transform_indices = @transform_1, window_bounds = array<i64: 8, 128>}, {transform_indices = @transform_2, window_bounds = array<i64: 1, 8, 128>}]} {
    %c1_i32 = arith.constant 1 : i32
    %0 = arith.muli %arg0, %c1_i32 : i32
    %1 = arith.addi %0, %arg1 : i32
    %c0_i32 = arith.constant 0 : i32
    %2 = arith.cmpi eq, %arg1, %c0_i32 : i32
    %3 = arith.extui %2 : i1 to i32
    %c0_i32_0 = arith.constant 0 : i32
    %4 = arith.cmpi ne, %3, %c0_i32_0 : i32
    scf.if %4 {
      %cst_21 = arith.constant 0.000000e+00 : f32
      %50 = vector.broadcast %cst_21 : f32 to vector<8x128xf32>
      %c0_22 = arith.constant 0 : index
      %c0_23 = arith.constant 0 : index
      %51 = vector.load %arg5[%c0_22, %c0_23] : memref<8x128xf32, #tpu.memory_space<vmem>>, vector<8x128xf32>
      tpu.vector_store %arg5[%c0_22, %c0_23], %50 {strides = array<i32>} : memref<8x128xf32, #tpu.memory_space<vmem>>, vector<8x128xf32>,
      %cst_24 = arith.constant 0.000000e+00 : f32
      %52 = vector.broadcast %cst_24 : f32 to vector<8x128xf32>
      %c0_25 = arith.constant 0 : index
      %c0_26 = arith.constant 0 : index
      %53 = vector.load %arg6[%c0_25, %c0_26] : memref<8x128xf32, #tpu.memory_space<vmem>>, vector<8x128xf32>
      tpu.vector_store %arg6[%c0_25, %c0_26], %52 {strides = array<i32>} : memref<8x128xf32, #tpu.memory_space<vmem>>, vector<8x128xf32>,
    } else {
    }
    %c0 = arith.constant 0 : index
    %c0_1 = arith.constant 0 : index
    %5 = vector.load %arg2[%c0, %c0_1] : memref<8x128xf32, #tpu.memory_space<vmem>>, vector<8x128xf32>
    %c0_2 = arith.constant 0 : index
    %c0_3 = arith.constant 0 : index
    %6 = vector.load %arg3[%c0_2, %c0_3] : memref<8x128xf32, #tpu.memory_space<vmem>>, vector<8x128xf32>
    %7 = arith.subf %5, %6 : vector<8x128xf32>
    %8 = math.absf %7 : vector<8x128xf32>
    %cst = arith.constant 1.000000e+00 : f32
    %9 = vector.broadcast %cst : f32 to vector<8x128xf32>
    %10 = arith.cmpf ole, %8, %9 : vector<8x128xf32>
    %cst_4 = arith.constant 5.000000e-01 : f32
    %11 = vector.broadcast %cst_4 : f32 to vector<8x128xf32>
    %12 = arith.mulf %11, %7 : vector<8x128xf32>
    %13 = arith.mulf %12, %7 : vector<8x128xf32>
    %cst_5 = arith.constant 5.000000e-01 : f32
    %14 = vector.broadcast %cst_5 : f32 to vector<8x128xf32>
    %15 = arith.subf %8, %14 : vector<8x128xf32>
    %16 = arith.select %10, %13, %15 : vector<8x128xi1>, vector<8x128xf32>
    %c127_i32 = arith.constant 127 : i32
    %17 = tpu.dynamic_rotate %5 by %c127_i32 dim 1 : vector<8x128xf32>, i32 -> vector<8x128xf32>
    %18 = arith.subf %17, %5 : vector<8x128xf32>
    %c127_i32_6 = arith.constant 127 : i32
    %19 = tpu.dynamic_rotate %6 by %c127_i32_6 dim 1 : vector<8x128xf32>, i32 -> vector<8x128xf32>
    %20 = arith.subf %19, %6 : vector<8x128xf32>
    %cst_7 = arith.constant 0.000000e+00 : f32
    %21 = vector.broadcast %cst_7 : f32 to vector<8x128xf32>
    %22 = arith.cmpf ogt, %18, %21 : vector<8x128xf32>
    %cst_8 = arith.constant 0.000000e+00 : f32
    %23 = vector.broadcast %cst_8 : f32 to vector<8x128xf32>
    %24 = arith.cmpf ogt, %20, %23 : vector<8x128xf32>
    %25 = arith.andi %22, %24 : vector<8x128xi1>
    %cst_9 = arith.constant 0.000000e+00 : f32
    %26 = vector.broadcast %cst_9 : f32 to vector<8x128xf32>
    %27 = arith.cmpf olt, %18, %26 : vector<8x128xf32>
    %cst_10 = arith.constant 0.000000e+00 : f32
    %28 = vector.broadcast %cst_10 : f32 to vector<8x128xf32>
    %29 = arith.cmpf olt, %20, %28 : vector<8x128xf32>
    %30 = arith.andi %27, %29 : vector<8x128xi1>
    %31 = arith.ori %25, %30 : vector<8x128xi1>
    %cst_11 = arith.constant 0.000000e+00 : f32
    %32 = vector.broadcast %cst_11 : f32 to vector<8x128xf32>
    %33 = arith.cmpf oeq, %18, %32 : vector<8x128xf32>
    %cst_12 = arith.constant 0.000000e+00 : f32
    %34 = vector.broadcast %cst_12 : f32 to vector<8x128xf32>
    %35 = arith.cmpf oeq, %20, %34 : vector<8x128xf32>
    %36 = arith.andi %33, %35 : vector<8x128xi1>
    %37 = arith.ori %31, %36 : vector<8x128xi1>
    %cst_13 = arith.constant 1.000000e+00 : f32
    %cst_14 = arith.constant 0.000000e+00 : f32
    %38 = vector.broadcast %cst_13 : f32 to vector<8x128xf32>
    %39 = vector.broadcast %cst_14 : f32 to vector<8x128xf32>
    %40 = arith.select %37, %38, %39 : vector<8x128xi1>, vector<8x128xf32>
    %c0_i32_15 = arith.constant 0 : i32
    %41 = arith.cmpi slt, %1, %c0_i32_15 : i32
    %42 = arith.extui %41 : i1 to i32
    %c0_i32_16 = arith.constant 0 : i32
    %43 = arith.cmpi ne, %42, %c0_i32_16 : i32
    scf.if %43 {
      %c0_21 = arith.constant 0 : index
      %c0_22 = arith.constant 0 : index
      %50 = vector.load %arg5[%c0_21, %c0_22] : memref<8x128xf32, #tpu.memory_space<vmem>>, vector<8x128xf32>
      %51 = arith.addf %50, %16 : vector<8x128xf32>
      %c0_23 = arith.constant 0 : index
      %c0_24 = arith.constant 0 : index
      %52 = vector.load %arg5[%c0_23, %c0_24] : memref<8x128xf32, #tpu.memory_space<vmem>>, vector<8x128xf32>
      tpu.vector_store %arg5[%c0_23, %c0_24], %51 {strides = array<i32>} : memref<8x128xf32, #tpu.memory_space<vmem>>, vector<8x128xf32>,
      %c0_25 = arith.constant 0 : index
      %c0_26 = arith.constant 0 : index
      %53 = vector.load %arg6[%c0_25, %c0_26] : memref<8x128xf32, #tpu.memory_space<vmem>>, vector<8x128xf32>
      %54 = arith.addf %53, %40 : vector<8x128xf32>
      %c0_27 = arith.constant 0 : index
      %c0_28 = arith.constant 0 : index
      %55 = vector.load %arg6[%c0_27, %c0_28] : memref<8x128xf32, #tpu.memory_space<vmem>>, vector<8x128xf32>
      tpu.vector_store %arg6[%c0_27, %c0_28], %54 {strides = array<i32>} : memref<8x128xf32, #tpu.memory_space<vmem>>, vector<8x128xf32>,
    } else {
    }
    %c0_i32_17 = arith.constant 0 : i32
    %44 = arith.cmpi sge, %1, %c0_i32_17 : i32
    %45 = arith.extui %44 : i1 to i32
    %c0_i32_18 = arith.constant 0 : i32
    %46 = arith.cmpi ne, %45, %c0_i32_18 : i32
    scf.if %46 {
      %c8_i32 = arith.constant 8 : i32
      %50 = arith.muli %1, %c8_i32 : i32
      %51 = tpu.iota {dimensions = array<i32: 0>} : vector<8x128xi32>
      %52 = vector.broadcast %50 : i32 to vector<8x128xi32>
      %53 = arith.addi %52, %51 : vector<8x128xi32>
      %c4_i32 = arith.constant 4 : i32
      %54 = vector.broadcast %c4_i32 : i32 to vector<8x128xi32>
      %55 = arith.cmpi slt, %53, %54 : vector<8x128xi32>
      %c0_21 = arith.constant 0 : index
      %c0_22 = arith.constant 0 : index
      %56 = vector.load %arg5[%c0_21, %c0_22] : memref<8x128xf32, #tpu.memory_space<vmem>>, vector<8x128xf32>
      %cst_23 = arith.constant 0.000000e+00 : f32
      %57 = vector.broadcast %cst_23 : f32 to vector<8x128xf32>
      %58 = arith.select %55, %16, %57 : vector<8x128xi1>, vector<8x128xf32>
      %59 = arith.addf %56, %58 : vector<8x128xf32>
      %c0_24 = arith.constant 0 : index
      %c0_25 = arith.constant 0 : index
      %60 = vector.load %arg5[%c0_24, %c0_25] : memref<8x128xf32, #tpu.memory_space<vmem>>, vector<8x128xf32>
      tpu.vector_store %arg5[%c0_24, %c0_25], %59 {strides = array<i32>} : memref<8x128xf32, #tpu.memory_space<vmem>>, vector<8x128xf32>,
      %c0_26 = arith.constant 0 : index
      %c0_27 = arith.constant 0 : index
      %61 = vector.load %arg6[%c0_26, %c0_27] : memref<8x128xf32, #tpu.memory_space<vmem>>, vector<8x128xf32>
      %cst_28 = arith.constant 0.000000e+00 : f32
      %62 = vector.broadcast %cst_28 : f32 to vector<8x128xf32>
      %63 = arith.select %55, %40, %62 : vector<8x128xi1>, vector<8x128xf32>
      %64 = arith.addf %61, %63 : vector<8x128xf32>
      %c0_29 = arith.constant 0 : index
      %c0_30 = arith.constant 0 : index
      %65 = vector.load %arg6[%c0_29, %c0_30] : memref<8x128xf32, #tpu.memory_space<vmem>>, vector<8x128xf32>
      tpu.vector_store %arg6[%c0_29, %c0_30], %64 {strides = array<i32>} : memref<8x128xf32, #tpu.memory_space<vmem>>, vector<8x128xf32>,
    } else {
    }
    %c0_i32_19 = arith.constant 0 : i32
    %47 = arith.cmpi eq, %arg1, %c0_i32_19 : i32
    %48 = arith.extui %47 : i1 to i32
    %c0_i32_20 = arith.constant 0 : i32
    %49 = arith.cmpi ne, %48, %c0_i32_20 : i32
    scf.if %49 {
      %c0_21 = arith.constant 0 : index
      %c0_22 = arith.constant 0 : index
      %50 = vector.load %arg5[%c0_21, %c0_22] : memref<8x128xf32, #tpu.memory_space<vmem>>, vector<8x128xf32>
      %51 = vector.shape_cast %50 : vector<8x128xf32> to vector<1x8x128xf32>
      %cst_23 = arith.constant dense<0.000000e+00> : vector<1xf32>
      %52 = vector.multi_reduction <add>, %51, %cst_23 [1, 2] : vector<1x8x128xf32> to vector<1xf32>
      %53 = vector.shape_cast %52 : vector<1xf32> to vector<1x1x1xf32>
      %54 = vector.extract %53[0, 0, 0] : f32 from vector<1x1x1xf32>
      %55 = tpu.iota {dimensions = array<i32: 1>} : vector<8x128xi32>
      %c127_i32_24 = arith.constant 127 : i32
      %56 = vector.broadcast %c127_i32_24 : i32 to vector<8x128xi32>
      %57 = arith.cmpi slt, %55, %56 : vector<8x128xi32>
      %c0_25 = arith.constant 0 : index
      %c0_26 = arith.constant 0 : index
      %58 = vector.load %arg6[%c0_25, %c0_26] : memref<8x128xf32, #tpu.memory_space<vmem>>, vector<8x128xf32>
      %cst_27 = arith.constant 0.000000e+00 : f32
      %59 = vector.broadcast %cst_27 : f32 to vector<8x128xf32>
      %60 = arith.select %57, %58, %59 : vector<8x128xi1>, vector<8x128xf32>
      %61 = vector.shape_cast %60 : vector<8x128xf32> to vector<1x8x128xf32>
      %cst_28 = arith.constant dense<0.000000e+00> : vector<1xf32>
      %62 = vector.multi_reduction <add>, %61, %cst_28 [1, 2] : vector<1x8x128xf32> to vector<1xf32>
      %63 = vector.shape_cast %62 : vector<1xf32> to vector<1x1x1xf32>
      %64 = vector.extract %63[0, 0, 0] : f32 from vector<1x1x1xf32>
      %65 = tpu.iota {dimensions = array<i32: 1>} : vector<1x8x128xi32>
      %66 = tpu.iota {dimensions = array<i32: 2>} : vector<1x8x128xi32>
      %c0_i32_29 = arith.constant 0 : i32
      %67 = vector.broadcast %c0_i32_29 : i32 to vector<1x8x128xi32>
      %68 = arith.cmpi eq, %65, %67 : vector<1x8x128xi32>
      %c0_i32_30 = arith.constant 0 : i32
      %69 = vector.broadcast %c0_i32_30 : i32 to vector<1x8x128xi32>
      %70 = arith.cmpi eq, %66, %69 : vector<1x8x128xi32>
      %71 = arith.andi %68, %70 : vector<1x8x128xi1>
      %c0_i32_31 = arith.constant 0 : i32
      %72 = vector.broadcast %c0_i32_31 : i32 to vector<1x8x128xi32>
      %73 = arith.cmpi eq, %65, %72 : vector<1x8x128xi32>
      %c1_i32_32 = arith.constant 1 : i32
      %74 = vector.broadcast %c1_i32_32 : i32 to vector<1x8x128xi32>
      %75 = arith.cmpi eq, %66, %74 : vector<1x8x128xi32>
      %76 = arith.andi %73, %75 : vector<1x8x128xi1>
      %cst_33 = arith.constant 0.000000e+00 : f32
      %77 = vector.broadcast %64 : f32 to vector<1x8x128xf32>
      %78 = vector.broadcast %cst_33 : f32 to vector<1x8x128xf32>
      %79 = arith.select %76, %77, %78 : vector<1x8x128xi1>, vector<1x8x128xf32>
      %80 = vector.broadcast %54 : f32 to vector<1x8x128xf32>
      %81 = arith.select %71, %80, %79 : vector<1x8x128xi1>, vector<1x8x128xf32>
      %c0_34 = arith.constant 0 : index
      %c0_35 = arith.constant 0 : index
      %c0_36 = arith.constant 0 : index
      %82 = vector.load %arg4[%c0_34, %c0_35, %c0_36] : memref<1x8x128xf32, #tpu.memory_space<vmem>>, vector<1x8x128xf32>
      tpu.vector_store %arg4[%c0_34, %c0_35, %c0_36], %81 {strides = array<i32>} : memref<1x8x128xf32, #tpu.memory_space<vmem>>, vector<1x8x128xf32>,
    } else {
    }
    return
  }
  func.func @transform_0(%arg0: i32, %arg1: i32) -> (i32, i32) {
    %c1_i32 = arith.constant 1 : i32
    %0 = arith.muli %arg0, %c1_i32 : i32
    %1 = arith.addi %0, %arg1 : i32
    %c0_i32 = arith.constant 0 : i32
    %2 = arith.minsi %1, %c0_i32 : i32
    %c0_i32_0 = arith.constant 0 : i32
    %c0_i32_1 = arith.constant 0 : i32
    return %2, %c0_i32_0 : i32, i32
  }
  func.func @transform_1(%arg0: i32, %arg1: i32) -> (i32, i32) {
    %c1_i32 = arith.constant 1 : i32
    %0 = arith.muli %arg0, %c1_i32 : i32
    %1 = arith.addi %0, %arg1 : i32
    %c0_i32 = arith.constant 0 : i32
    %2 = arith.minsi %1, %c0_i32 : i32
    %c0_i32_0 = arith.constant 0 : i32
    %c0_i32_1 = arith.constant 0 : i32
    return %2, %c0_i32_0 : i32, i32
  }
  func.func @transform_2(%arg0: i32, %arg1: i32) -> (i32, i32, i32) {
    %c0_i32 = arith.constant 0 : i32
    %c0_i32_0 = arith.constant 0 : i32
    %c0_i32_1 = arith.constant 0 : i32
    return %arg0, %c0_i32, %c0_i32_0 : i32, i32, i32
  }
}

</mosaic_0001>

<bundles_post_ra>
// kernel: tpu_custom_call.1
= control target key start
LH: loop header
LB: loop body
LE: loop exit
PB: predicated region body
PF: predicated region fallthrough
CT: control target
= control target key end

     0   :  { %7 = vsyncpa [#allocation5], 0  ;;  %s324_s0 = inlined_call_operand.hbm [shape: f32[4,128], index: 0, kind: input, shape index: {}]   ;;  %s325_s1 = inlined_call_operand.hbm [shape: f32[4,128], index: 1, kind: input, shape index: {}]   ;;  %s326_s2 = inlined_call_operand.hbm [shape: f32[1,8,128], index: 2, kind: output, shape index: {}]  }
   0x1   :  { %8 = vsyncpa [#allocation8], 0 }
   0x2   :  { %9 = vsyncpa [#allocation6], 0 }
   0x3   :  { %20 = vsyncadd [#allocation5], 64  ;;  %s25_s11 = sshll.u32 %s324_s0, 4  ;;  %s291_s12 = smov [#allocation4]   ;;  %s26_s11 = int_to_ptr.hbm [resolvable:$true] %s25_s11 }
   0x4   :  { %s27_s13 = sshll.u32 %s291_s12, 4  ;;  %s292_s14 = smov 64   ;;  %s28_s13 = int_to_ptr.vmem [resolvable:$true] %s27_s13 }
   0x5   :  { %s293_s15 = smov 4  }
   0x6   :  { %33 = dma.hbm_to_vmem [thread:$0]  %s26_s11, 64, %s28_s13, [#allocation5], %s292_s14, %s292_s14, %s293_s15  }
   0x7   :  { %44 = vsyncadd [#allocation8], 64  ;;  %s49_s18 = sshll.u32 %s325_s1, 4  ;;  %s294_s19 = smov [#allocation7]   ;;  %s50_s18 = int_to_ptr.hbm [resolvable:$true] %s49_s18 }
   0x8   :  { %s51_s20 = sshll.u32 %s294_s19, 4  ;;  %s52_s20 = int_to_ptr.vmem [resolvable:$true] %s51_s20 }
   0x9   :  { %57 = dma.hbm_to_vmem [thread:$0]  %s50_s18, 64, %s52_s20, [#allocation8], %s292_s14, %s292_s14, %s293_s15  }
   0xa   :  { %285 = dma.done.wait [#allocation5], 128  }
   0xb   :  { %286 = vsyncadd [#allocation5], 4294967168 }
   0xc   :  { %287 = dma.done.wait [#allocation8], 128  }
   0xd   :  { %288 = vsyncadd [#allocation8], 4294967168  ;;  %v85_v0 = vld [vmem:[#allocation4] sm:$0xff]  ;;  %s295_s0 = smov 127   ;;  %v86_v1 = vld [vmem:[#allocation7] sm:$0xff]  ;;  %v127_v5 = vlaneseq  ;;  %v296_v16 = vmov 0.0  }
   0xe   :  { %94 = vrot.lane.b32.xlu0 %v85_v0, %s295_s0  ;;  %v87_v2 = vsub.f32 %v85_v0, %v86_v1  ;;  %s297_s1 = smov [#allocation9]   ;;  %s186_s25 = sshll.u32 %s326_s2, 4  ;;  %s187_s25 = int_to_ptr.hbm [resolvable:$true] %s186_s25 }
   0xf   :  { %v128_v8 = vshrl.u32 %v127_v5, 7  ;;  %v154_v15 = vand.u32 127, %v127_v5  ;;  %s184_s21 = sshll.u32 %s297_s1, 4  ;;  %s185_s21 = int_to_ptr.vmem [resolvable:$true] %s184_s21 }
  0x10   :  { %v88_v3 = vand.u32 2147483647, %v87_v2  ;;  %v90_v4 = vmul.f32 0.5, %v87_v2 }
  0x11   :  { %vm131_vm1 = vcmp.lt.s32.totalorder %v128_v8, 4  ;;  %vm155_vm13 = vcmp.lt.s32.totalorder %v154_v15, 127  ;;  %vm169_vm14 = vcmp.eq.s32.totalorder %v128_v8, 0  ;;  %vm172_vm15 = vcmp.eq.s32.totalorder %v154_v15, 1 }
  0x12   :  { %v91_v6 = vmul.f32 %v90_v4, %v87_v2  ;;  %v201_v7 = vadd.f32 -0.5, %v88_v3  ;;  %vm89_vm0 = vcmp.le.f32.partialorder %v88_v3, 1.0 }
  0x14   :  { %v93_v9 = vsel %vm89_vm0, %v91_v6, %v201_v7  ;;  %vm170_vm0 = vcmp.eq.s32.totalorder %v154_v15, 0 }
  0x15   :  { %v133_v10 = vsel %vm131_vm1, %v93_v9, 0.0 }
  0x16   :  { %97 = vrot.lane.b32.xlu0 %v86_v1, %s295_s0  ;;  %144 = vadd.xlane.f32.xlu1 %v133_v10 }
  0x80   :  { %v95_v11 = vpop.permute.xlu0 %94 }
  0x81   :  { %v96_v12 = vsub.f32 %v95_v11, %v85_v0 }
  0x83   :  { %vm100_vm2 = vcmp.gt.f32.partialorder %v96_v12, 0.0  ;;  %vm103_vm5 = vcmp.lt.f32.partialorder %v96_v12, 0.0  ;;  %vm107_vm9 = vcmp.eq.f32.partialorder %v96_v12, 0.0 }
  0x88   :  { %v98_v13 = vpop.permute.xlu0 %97 }
  0x89   :  { %v99_v14 = vsub.f32 %v98_v13, %v86_v1  ;;  %v145_v20 = vpop.xlane.xlu1 %144 }
  0x8a   :  { %v146_v21 = vrot.slane %v145_v20, 4 }
  0x8b   :  { %vm101_vm3 = vcmp.gt.f32.partialorder %v99_v14, 0.0  ;;  %vm104_vm4 = vcmp.lt.f32.partialorder %v99_v14, 0.0  ;;  %vm108_vm6 = vcmp.eq.f32.partialorder %v99_v14, 0.0 }
  0x8c   :  { %vm102_vm7 = vmand %vm100_vm2, %vm101_vm3  ;;  %v147_v22 = vadd.f32 %v146_v21, %v145_v20 }
  0x8d   :  { %vm105_vm8 = vmand %vm103_vm5, %vm104_vm4 }
  0x8e   :  { %vm106_vm10 = vmor %vm102_vm7, %vm105_vm8  ;;  %v148_v23 = vrot.slane %v147_v22, 2 }
  0x8f   :  { %vm109_vm11 = vmand %vm107_vm9, %vm108_vm6 }
  0x90   :  { %vm110_vm12 = vmor %vm106_vm10, %vm109_vm11  ;;  %v149_v24 = vadd.f32 %v148_v23, %v147_v22 }
  0x91   :  { %v111_v17 = vsel %vm110_vm12, 1.0, %v296_v16  ;;  %vm171_vm2 = vmand %vm169_vm14, %vm170_vm0 }
  0x92   :  { %v137_v18 = vsel %vm131_vm1, %v111_v17, 0.0  ;;  %v150_v25 = vrot.slane %v149_v24, 1  ;;  %vm173_vm1 = vmand %vm169_vm14, %vm172_vm15 }
  0x93   :  { %v157_v19 = vsel %vm155_vm13, %v137_v18, 0.0 }
  0x94   :  { %158 = vadd.xlane.f32.xlu1 %v157_v19  ;;  %v151_v26 = vadd.f32 %v150_v25, %v149_v24 }
  0x96   :  { %202 = vpush %v151_v26 }
  0xc7   :  { %s203_s22 = spop %202 }
  0xc8   :  { %v176_v35 = vstv %s203_s22 }
 0x107   :  { %v159_v27 = vpop.xlane.xlu1 %158 }
 0x108   :  { %v160_v28 = vrot.slane %v159_v27, 4 }
 0x10a   :  { %v161_v29 = vadd.f32 %v160_v28, %v159_v27 }
 0x10c   :  { %v162_v30 = vrot.slane %v161_v29, 2 }
 0x10e   :  { %v163_v31 = vadd.f32 %v162_v30, %v161_v29 }
 0x110   :  { %v164_v32 = vrot.slane %v163_v31, 1 }
 0x112   :  { %v165_v33 = vadd.f32 %v164_v32, %v163_v31 }
 0x114   :  { %204 = vpush %v165_v33 }
 0x145   :  { %s205_s26 = spop %204 }
 0x146   :  { %v174_v34 = vstv %s205_s26 }
 0x147   :  { %v175_v36 = vsel %vm173_vm1, %v174_v34, 0.0 }
 0x148   :  { %v177_v37 = vsel %vm171_vm2, %v176_v35, %v175_v36 }
 0x149   :  { %178 = vst [vmem:[#allocation9] sm:$0xff] %v177_v37 }
 0x14a   :  { %189 = dma.vmem_to_hbm [thread:$0]  %s185_s21, 128, %s187_s25, [#allocation6]  }
 0x14b   :  { %289 = dma.done.wait [#allocation6], 128  }
 0x14c   :  { %290 = vsyncadd [#allocation6], 4294967168 }
 0x14d   :  { %194 = vsyncpa [#allocation5], 1 }
 0x14e   :  { %195 = vsyncpa [#allocation8], 1 }
 0x14f   :  { %196 = vsyncpa [#allocation6], 1 }

</bundles_post_ra>
